<compile_context>
chip_gen: v6e
topology: v6e:2x2x1
jax: 0.10.0
libtpu: 0.0.40
codegen_flags: <defaults>
</compile_context>

<pallas_src>
import functools
import math

import jax
import jax.numpy as jnp
from jax import lax
from jax.experimental import pallas as pl
from jax.experimental.pallas import tpu as pltpu


_VMEM_LIMIT = 48 * 1024 * 1024   # safe on v7x (64 MiB physical), plenty on v5e/v6e


# ---------------------------------------------------------------------------
# helpers
# ---------------------------------------------------------------------------
def _pick_tile(dim: int, preferred: int, multiples=(256, 128, 8)) -> int:
    """Largest tile <= preferred that divides `dim` and is a multiple of one of
    `multiples` (tried in order); falls back to the full dim (always legal)."""
    if dim <= preferred:
        return dim
    for m in multiples:
        best = 0
        t = m
        while t <= preferred:
            if dim % t == 0:
                best = t
            t += m
        if best:
            return best
    return dim


# ---------------------------------------------------------------------------
# tiled matmul kernels (optional bias) -- QKV projection and out_proj
# ---------------------------------------------------------------------------
def _matmul_kernel(x_ref, w_ref, o_ref, acc_ref):
    @pl.when(pl.program_id(2) == 0)
    def _():
        acc_ref[...] = jnp.zeros_like(acc_ref)

    acc_ref[...] += jnp.dot(x_ref[...], w_ref[...],
                            preferred_element_type=jnp.float32)

    @pl.when(pl.program_id(2) == pl.num_programs(2) - 1)
    def _():
        o_ref[...] = acc_ref[...].astype(o_ref.dtype)


def _matmul_bias_kernel(x_ref, w_ref, b_ref, o_ref, acc_ref):
    @pl.when(pl.program_id(2) == 0)
    def _():
        acc_ref[...] = jnp.zeros_like(acc_ref)

    acc_ref[...] += jnp.dot(x_ref[...], w_ref[...],
                            preferred_element_type=jnp.float32)

    @pl.when(pl.program_id(2) == pl.num_programs(2) - 1)
    def _():
        o_ref[...] = (acc_ref[...] + b_ref[...]).astype(o_ref.dtype)


def _matmul(x2d, w, b, out_dtype):
    """x2d: (M, K); w: (K, N); b: (1, N) f32 or None. Returns (M, N)."""
    M, K = x2d.shape
    _, N = w.shape
    # Large tiles: W is re-streamed M/tm times, X N/tn times -> amortize HBM.
    tm = _pick_tile(M, 512, (256, 128, 8))
    tn = _pick_tile(N, 1024, (256, 128))
    tk = _pick_tile(K, 512, (256, 128))
    grid = (M // tm, N // tn, K // tk)

    bytes_accessed = (M * K + K * N) * x2d.dtype.itemsize + M * N * jnp.dtype(out_dtype).itemsize
    if b is not None:
        bytes_accessed += N * 4
    cost = pl.CostEstimate(flops=2 * M * N * K, transcendentals=0,
                           bytes_accessed=bytes_accessed)

    in_specs = [
        pl.BlockSpec((tm, tk), lambda i, j, k: (i, k)),
        pl.BlockSpec((tk, tn), lambda i, j, k: (k, j)),
    ]
    operands = [x2d, w]
    kernel = _matmul_kernel
    if b is not None:
        in_specs.append(pl.BlockSpec((1, tn), lambda i, j, k: (0, j)))
        operands.append(b)
        kernel = _matmul_bias_kernel

    return pl.pallas_call(
        kernel,
        out_shape=jax.ShapeDtypeStruct((M, N), out_dtype),
        grid_spec=pltpu.PrefetchScalarGridSpec(
            num_scalar_prefetch=0,
            grid=grid,
            in_specs=in_specs,
            out_specs=pl.BlockSpec((tm, tn), lambda i, j, k: (i, j)),
            scratch_shapes=[pltpu.VMEM((tm, tn), jnp.float32)],
        ),
        compiler_params=pltpu.CompilerParams(
            dimension_semantics=("parallel", "parallel", "arbitrary"),
            vmem_limit_bytes=_VMEM_LIMIT,
        ),
        cost_estimate=cost,
    )(*operands)


# ---------------------------------------------------------------------------
# flash-attention kernel (causal, online softmax)
# ---------------------------------------------------------------------------
def _flash_kernel(q_ref, k_ref, v_ref, o_ref, m_sc, l_sc, acc_sc, *,
                  tq: int, tk: int):
    qi = pl.program_id(1)
    ki = pl.program_id(2)
    nk = pl.num_programs(2)

    @pl.when(ki == 0)
    def _():
        # Large finite negative (not -inf); causal iteration starts at ki==0 so
        # no query row is ever fully masked -> no NaNs.  (Invariant: kv axis
        # must start at 0 and the ki==0 tile must contain unmasked columns.)
        m_sc[...] = jnp.full_like(m_sc, -1e30)
        l_sc[...] = jnp.zeros_like(l_sc)
        acc_sc[...] = jnp.zeros_like(acc_sc)

    q_row0 = qi * tq
    k_col0 = ki * tk

    def _online_softmax_update(s):
        m_prev = m_sc[...]
        m_new = jnp.maximum(m_prev, jnp.max(s, axis=-1, keepdims=True))
        alpha = jnp.exp(m_prev - m_new)
        p = jnp.exp(s - m_new)                              # f32 softmax stats
        l_sc[...] = alpha * l_sc[...] + jnp.sum(p, axis=-1, keepdims=True)
        acc_sc[...] = alpha * acc_sc[...] + jnp.dot(
            p.astype(v_ref.dtype), v_ref[0],
            preferred_element_type=jnp.float32)
        m_sc[...] = m_new

    # Compute only on KV tiles at or below the causal diagonal.  Fully-masked
    # tiles also have their DMA elided via the clamped index_map (see wrapper).
    @pl.when(k_col0 <= q_row0 + (tq - 1))
    def _():
        # scores = q @ k^T (scale already folded into Wq): contract over head_dim,
        # no materialized transpose of the K tile.
        s = lax.dot_general(
            q_ref[0], k_ref[0],
            dimension_numbers=(((1,), (1,)), ((), ())),
            preferred_element_type=jnp.float32)

        needs_mask = k_col0 + (tk - 1) > q_row0             # straddles diagonal

        @pl.when(needs_mask)
        def _():
            row = q_row0 + lax.broadcasted_iota(jnp.int32, (tq, 1), 0)
            col = k_col0 + lax.broadcasted_iota(jnp.int32, (1, tk), 1)
            _online_softmax_update(jnp.where(col > row, -1e30, s))

        @pl.when(jnp.logical_not(needs_mask))
        def _():
            _online_softmax_update(s)                       # mask-free fast path

    @pl.when(ki == nk - 1)
    def _():
        # EUP approximate reciprocal + one Newton step (keeps divide off VALU).
        l = l_sc[...]
        inv = pl.reciprocal(l, approx=True)
        inv = inv * (2.0 - l * inv)
        o_ref[0] = (acc_sc[...] * inv).astype(o_ref.dtype)


def _flash_tiles(T):
    tq = _pick_tile(T, 256, (256, 128, 8))
    tk = _pick_tile(T, 512, (256, 128, 8))
    return tq, tk


def _flash_cost(BH, T, hd, itemsize):
    # Causal: roughly half the score/PV work; advisory only.
    return pl.CostEstimate(
        flops=2 * BH * T * T * hd,
        transcendentals=(BH * T * T) // 2,
        bytes_accessed=4 * BH * T * hd * itemsize,
    )


def _flash_compiler_params():
    return pltpu.CompilerParams(
        dimension_semantics=("parallel", "parallel", "arbitrary"),
        vmem_limit_bytes=_VMEM_LIMIT,
    )


def _flash_scratch(tq, hd):
    return [
        pltpu.VMEM((tq, 1), jnp.float32),    # running max  m
        pltpu.VMEM((tq, 1), jnp.float32),    # running sum  l
        pltpu.VMEM((tq, hd), jnp.float32),   # output accumulator
    ]


def _flash_attention_fused(qkv, *, B, T, d_out, num_heads, out_dtype):
    """Direct-BlockSpec path (head_dim multiple of 128):
    qkv: (B, T, 3*d_out) laid out as [Q | K | V]; returns ctx (B, T, d_out)."""
    hd = d_out // num_heads
    nH = num_heads
    tq, tk = _flash_tiles(T)
    nq, nk = T // tq, T // tk

    def kv_block(qi, ki):
        # Clamp the kv block index at the causal diagonal so fully-masked grid
        # steps reuse the previous block -> Pallas elides the re-DMA.
        ki_max = (qi * tq + (tq - 1)) // tk
        return jnp.minimum(ki, ki_max)

    q_spec = pl.BlockSpec((1, tq, hd),
                          lambda bh, qi, ki: (bh // nH, qi, bh % nH))
    k_spec = pl.BlockSpec((1, tk, hd),
                          lambda bh, qi, ki: (bh // nH, kv_block(qi, ki), nH + bh % nH))
    v_spec = pl.BlockSpec((1, tk, hd),
                          lambda bh, qi, ki: (bh // nH, kv_block(qi, ki), 2 * nH + bh % nH))
    o_spec = pl.BlockSpec((1, tq, hd),
                          lambda bh, qi, ki: (bh // nH, qi, bh % nH))

    kernel = functools.partial(_flash_kernel, tq=tq, tk=tk)
    return pl.pallas_call(
        kernel,
        out_shape=jax.ShapeDtypeStruct((B, T, d_out), out_dtype),
        grid_spec=pltpu.PrefetchScalarGridSpec(
            num_scalar_prefetch=0,
            grid=(B * nH, nq, nk),
            in_specs=[q_spec, k_spec, v_spec],
            out_specs=o_spec,
            scratch_shapes=_flash_scratch(tq, hd),
        ),
        compiler_params=_flash_compiler_params(),
        cost_estimate=_flash_cost(B * nH, T, hd, qkv.dtype.itemsize),
    )(qkv, qkv, qkv)


def _flash_attention(q, k, v):
    """Fallback path: q, k, v pre-split as (B*H, T, head_dim)."""
    BH, T, hd = q.shape
    tq, tk = _flash_tiles(T)
    nq, nk = T // tq, T // tk

    def kv_block(qi, ki):
        ki_max = (qi * tq + (tq - 1)) // tk
        return jnp.minimum(ki, ki_max)

    kernel = functools.partial(_flash_kernel, tq=tq, tk=tk)
    return pl.pallas_call(
        kernel,
        out_shape=jax.ShapeDtypeStruct((BH, T, hd), q.dtype),
        grid_spec=pltpu.PrefetchScalarGridSpec(
            num_scalar_prefetch=0,
            grid=(BH, nq, nk),
            in_specs=[
                pl.BlockSpec((1, tq, hd), lambda bh, qi, ki: (bh, qi, 0)),
                pl.BlockSpec((1, tk, hd), lambda bh, qi, ki: (bh, kv_block(qi, ki), 0)),
                pl.BlockSpec((1, tk, hd), lambda bh, qi, ki: (bh, kv_block(qi, ki), 0)),
            ],
            out_specs=pl.BlockSpec((1, tq, hd), lambda bh, qi, ki: (bh, qi, 0)),
            scratch_shapes=_flash_scratch(tq, hd),
        ),
        compiler_params=_flash_compiler_params(),
        cost_estimate=_flash_cost(BH, T, hd, q.dtype.itemsize),
    )(q, k, v)


# ---------------------------------------------------------------------------
# full forward pass (matches the PyTorch module in eval mode)
# ---------------------------------------------------------------------------
def multi_head_attention(x, wq_t, wk_t, wv_t, wo_t, bo, *, num_heads,
                         compute_dtype=None):
    """x: (B, T, d_in); w*_t: (in, out) (nn.Linear weights pre-transposed);
    bo: (d_out,). Returns (B, T, d_out).

    compute_dtype (e.g. jnp.bfloat16) sets the MXU-operand / HBM-traffic dtype;
    matmul accumulation and softmax statistics always stay float32.
    """
    B, T, d_in = x.shape
    d_out = wq_t.shape[1]
    assert d_out % num_heads == 0
    hd = d_out // num_heads
    scale = 1.0 / math.sqrt(hd)

    if compute_dtype is None:
        compute_dtype = x.dtype
    x = x.astype(compute_dtype)
    # Fold the softmax scale into Wq (weight-only, zero per-token cost).
    w_qkv = jnp.concatenate([wq_t * scale, wk_t, wv_t], axis=1).astype(compute_dtype)
    wo_c = wo_t.astype(compute_dtype)
    b_o = bo.reshape(1, d_out).astype(jnp.float32)

    # 1) fused, lane-dense, bias-free QKV projection (qkv_bias=False)
    x2d = x.reshape(B * T, d_in)
    qkv2d = _matmul(x2d, w_qkv, None, compute_dtype)          # (B*T, 3*d_out)

    # 2) causal flash attention
    if hd % 128 == 0:
        # Heads indexed directly via BlockSpec: no split/transpose HBM round-trips.
        qkv = qkv2d.reshape(B, T, 3 * d_out)
        ctx = _flash_attention_fused(qkv, B=B, T=T, d_out=d_out,
                                     num_heads=num_heads,
                                     out_dtype=compute_dtype)  # (B, T, d_out)
        ctx2d = ctx.reshape(B * T, d_out)
    else:
        # head_dim < 128: block last-dim must equal the full array dim, so fall
        # back to XLA layout plumbing into (B*H, T, head_dim).
        q2d, k2d, v2d = jnp.split(qkv2d, 3, axis=-1)

        def to_heads(a):
            return (a.reshape(B, T, num_heads, hd)
                     .transpose(0, 2, 1, 3)
                     .reshape(B * num_heads, T, hd))

        ctx = _flash_attention(to_heads(q2d), to_heads(k2d), to_heads(v2d))
        ctx2d = (ctx.reshape(B, num_heads, T, hd)
                    .transpose(0, 2, 1, 3)
                    .reshape(B * T, d_out))

    # 3) output projection
    out2d = _matmul(ctx2d, wo_c, b_o, compute_dtype)           # (B*T, d_out)
    return out2d.reshape(B, T, d_out)


# ---------------------------------------------------------------------------
# pure-JAX reference (mirrors the PyTorch forward in eval mode)
# ---------------------------------------------------------------------------
def _reference(x, wq_t, wk_t, wv_t, wo_t, bo, *, num_heads):
    B, T, d_in = x.shape
    d_out = wq_t.shape[1]
    hd = d_out // num_heads
    q = (x @ wq_t).reshape(B, T, num_heads, hd).transpose(0, 2, 1, 3)
    k = (x @ wk_t).reshape(B, T, num_heads, hd).transpose(0, 2, 1, 3)
    v = (x @ wv_t).reshape(B, T, num_heads, hd).transpose(0, 2, 1, 3)
    scores = jnp.einsum("bhqd,bhkd->bhqk", q, k) / math.sqrt(hd)
    mask = jnp.triu(jnp.ones((T, T), bool), k=1)
    scores = jnp.where(mask, -jnp.inf, scores)
    attn = jax.nn.softmax(scores, axis=-1)
    ctx = jnp.einsum("bhqk,bhkd->bhqd", attn, v).transpose(0, 2, 1, 3).reshape(B, T, d_out)
    return ctx @ wo_t + bo


def _make_params(key, d_in, d_out):
    kq, kk, kv, ko, kb = jax.random.split(key, 5)
    s_in = 1.0 / math.sqrt(d_in)
    s_out = 1.0 / math.sqrt(d_out)
    wq_t = jax.random.uniform(kq, (d_in, d_out), jnp.float32, -s_in, s_in)
    wk_t = jax.random.uniform(kk, (d_in, d_out), jnp.float32, -s_in, s_in)
    wv_t = jax.random.uniform(kv, (d_in, d_out), jnp.float32, -s_in, s_in)
    wo_t = jax.random.uniform(ko, (d_out, d_out), jnp.float32, -s_out, s_out)
    bo = jax.random.uniform(kb, (d_out,), jnp.float32, -s_out, s_out)
    return wq_t, wk_t, wv_t, wo_t, bo


if __name__ == "__main__":
    key = jax.random.PRNGKey(0)
    k1, k2, kp1, kp2 = jax.random.split(key, 4)

    # --- Test 1: module-like small shapes (fallback path, head_dim=8) ------
    B, T, d_in, d_out, num_heads = 2, 8, 32, 32, 4
    x = jax.random.normal(k1, (B, T, d_in), dtype=jnp.float32)
    wq_t, wk_t, wv_t, wo_t, bo = _make_params(kp1, d_in, d_out)

    ref = _reference(x, wq_t, wk_t, wv_t, wo_t, bo, num_heads=num_heads)

    out_f32 = multi_head_attention(x, wq_t, wk_t, wv_t, wo_t, bo, num_heads=num_heads)
    out_f32 = jax.block_until_ready(out_f32)
    assert out_f32.shape == (B, T, d_out)
    assert jnp.allclose(out_f32, ref, atol=1e-4, rtol=1e-4)

    out_bf16 = multi_head_attention(x, wq_t, wk_t, wv_t, wo_t, bo,
                                    num_heads=num_heads, compute_dtype=jnp.bfloat16)
    out_bf16 = jax.block_until_ready(out_bf16)
    assert out_bf16.shape == (B, T, d_out)
    assert jnp.allclose(out_bf16.astype(jnp.float32), ref, atol=5e-2, rtol=5e-2)

    # --- Test 2: head_dim=128 exercises the fused (no-transpose) path ------
    B2, T2, d_in2, d_out2, heads2 = 2, 16, 32, 256, 2
    x2 = jax.random.normal(k2, (B2, T2, d_in2), dtype=jnp.float32)
    wq2, wk2, wv2, wo2, bo2 = _make_params(kp2, d_in2, d_out2)

    ref2 = _reference(x2, wq2, wk2, wv2, wo2, bo2, num_heads=heads2)
    out2 = multi_head_attention(x2, wq2, wk2, wv2, wo2, bo2, num_heads=heads2)
    out2 = jax.block_until_ready(out2)
    assert out2.shape == (B2, T2, d_out2)
    assert jnp.allclose(out2, ref2, atol=1e-4, rtol=1e-4)

    print("KERNEL_OK")
</pallas_src>

<mosaic_0001>
module attributes {stable_mosaic.version = 11 : i64} {
  func.func @_matmul_kernel(%arg0: i32, %arg1: i32, %arg2: i32, %arg3: memref<16x32xf32, #tpu.memory_space<vmem>>, %arg4: memref<32x96xf32, #tpu.memory_space<vmem>>, %arg5: memref<16x96xf32, #tpu.memory_space<vmem>>, %arg6: memref<16x96xf32, #tpu.memory_space<vmem>>) attributes {dimension_semantics = [#tpu.dimension_semantics<parallel>, #tpu.dimension_semantics<parallel>, #tpu.dimension_semantics<arbitrary>], iteration_bounds = array<i64: 1, 1, 1>, scalar_prefetch = 0 : i64, scratch_operands = 1 : i64, tpu.core_type = #tpu.core_type<tc>, window_params = [{transform_indices = @transform_0, window_bounds = array<i64: 16, 32>}, {transform_indices = @transform_1, window_bounds = array<i64: 32, 96>}, {transform_indices = @transform_2, window_bounds = array<i64: 16, 96>}]} {
    %c0_i32 = arith.constant 0 : i32
    %0 = arith.cmpi eq, %arg2, %c0_i32 : i32
    %1 = arith.extui %0 : i1 to i32
    %c0_i32_0 = arith.constant 0 : i32
    %2 = arith.cmpi ne, %1, %c0_i32_0 : i32
    scf.if %2 {
      %cst_10 = arith.constant 0.000000e+00 : f32
      %12 = vector.broadcast %cst_10 : f32 to vector<16x96xf32>
      %c0_11 = arith.constant 0 : index
      %c0_12 = arith.constant 0 : index
      %13 = vector.load %arg6[%c0_11, %c0_12] : memref<16x96xf32, #tpu.memory_space<vmem>>, vector<16x96xf32>
      tpu.vector_store %arg6[%c0_11, %c0_12], %12 {strides = array<i32>} : memref<16x96xf32, #tpu.memory_space<vmem>>, vector<16x96xf32>,
    } else {
    }
    %c0 = arith.constant 0 : index
    %c0_1 = arith.constant 0 : index
    %3 = vector.load %arg6[%c0, %c0_1] : memref<16x96xf32, #tpu.memory_space<vmem>>, vector<16x96xf32>
    %c0_2 = arith.constant 0 : index
    %c0_3 = arith.constant 0 : index
    %4 = vector.load %arg3[%c0_2, %c0_3] : memref<16x32xf32, #tpu.memory_space<vmem>>, vector<16x32xf32>
    %c0_4 = arith.constant 0 : index
    %c0_5 = arith.constant 0 : index
    %5 = vector.load %arg4[%c0_4, %c0_5] : memref<32x96xf32, #tpu.memory_space<vmem>>, vector<32x96xf32>
    %cst = arith.constant dense<0.000000e+00> : vector<16x96xf32>
    %6 = tpu.matmul %4, %5, %cst {dimension_numbers = #tpu.dot_dimension_numbers<[1], [0], [0], [1], [0, 0, 1, 1], [], []>} : vector<16x32xf32>, vector<32x96xf32>, vector<16x96xf32> -> vector<16x96xf32>
    %7 = arith.addf %3, %6 : vector<16x96xf32>
    %c0_6 = arith.constant 0 : index
    %c0_7 = arith.constant 0 : index
    %8 = vector.load %arg6[%c0_6, %c0_7] : memref<16x96xf32, #tpu.memory_space<vmem>>, vector<16x96xf32>
    tpu.vector_store %arg6[%c0_6, %c0_7], %7 {strides = array<i32>} : memref<16x96xf32, #tpu.memory_space<vmem>>, vector<16x96xf32>,
    %c0_i32_8 = arith.constant 0 : i32
    %9 = arith.cmpi eq, %arg2, %c0_i32_8 : i32
    %10 = arith.extui %9 : i1 to i32
    %c0_i32_9 = arith.constant 0 : i32
    %11 = arith.cmpi ne, %10, %c0_i32_9 : i32
    scf.if %11 {
      %c0_10 = arith.constant 0 : index
      %c0_11 = arith.constant 0 : index
      %12 = vector.load %arg6[%c0_10, %c0_11] : memref<16x96xf32, #tpu.memory_space<vmem>>, vector<16x96xf32>
      %c0_12 = arith.constant 0 : index
      %c0_13 = arith.constant 0 : index
      %13 = vector.load %arg5[%c0_12, %c0_13] : memref<16x96xf32, #tpu.memory_space<vmem>>, vector<16x96xf32>
      tpu.vector_store %arg5[%c0_12, %c0_13], %12 {strides = array<i32>} : memref<16x96xf32, #tpu.memory_space<vmem>>, vector<16x96xf32>,
    } else {
    }
    return
  }
  func.func @transform_0(%arg0: i32, %arg1: i32, %arg2: i32) -> (i32, i32) {
    %c0_i32 = arith.constant 0 : i32
    return %arg0, %arg2 : i32, i32
  }
  func.func @transform_1(%arg0: i32, %arg1: i32, %arg2: i32) -> (i32, i32) {
    %c0_i32 = arith.constant 0 : i32
    return %arg2, %arg1 : i32, i32
  }
  func.func @transform_2(%arg0: i32, %arg1: i32, %arg2: i32) -> (i32, i32) {
    %c0_i32 = arith.constant 0 : i32
    return %arg0, %arg1 : i32, i32
  }
}

</mosaic_0001>

<bundles_post_ra>
// kernel: tpu_custom_call.1
= control target key start
LH: loop header
LB: loop body
LE: loop exit
PB: predicated region body
PF: predicated region fallthrough
CT: control target
= control target key end

     0   :  { %7 = vsyncpa [#allocation4], 0  ;;  %s305_s0 = inlined_call_operand.hbm [shape: f32[16,32], index: 0, kind: input, shape index: {}]   ;;  %s306_s1 = inlined_call_operand.hbm [shape: f32[32,96], index: 1, kind: input, shape index: {}]   ;;  %s307_s2 = inlined_call_operand.hbm [shape: f32[16,96], index: 2, kind: output, shape index: {}]  }
   0x1   :  { %8 = vsyncpa [#allocation7], 0 }
   0x2   :  { %9 = vsyncpa [#allocation5], 0  ;;  %s258_s9 = smov [#allocation3]  }
   0x3   :  { %s15_s10 = sshll.u32 %s258_s9, 4  ;;  %s16_s10 = int_to_ptr.vmem [resolvable:$true] %s15_s10 }
   0x4   :  { %s200_s11 = scalar_lea.vmem %s16_s10, 256  ;;  %p205_p1 = scmp.lt.s32.totalorder %s16_s10, %s16_s10 }
   0x5   :  { %p201_p0 = scmp.ne.s32.totalorder %s16_s10, %s200_s11  ;;  %p206_p2 = scmp.lt.s32.totalorder %s200_s11, %s200_s11 }
   0x7   :  { %p207_p3 = por %p206_p2, %p205_p1 }
   0x9   :  { %p208_p4 = pnand %p207_p3, %p201_p0 }
   0xb   :  { %211 = shalt.err (!%p208_p4)
}
   0xc   :  { %s259_s12 = smov 128   ;;  %s260_s13 = smov 8  }
   0xd   :  { %21 = dma.hbm_to_vmem [thread:$0]  %s305_s0, 256, %s16_s10, [#allocation4], %s259_s12, %s259_s12, %s260_s13  }
   0xe   :  { %s261_s16 = smov [#allocation6]  }
   0xf   :  { %s27_s17 = sshll.u32 %s261_s16, 4  ;;  %s28_s17 = int_to_ptr.vmem [resolvable:$true] %s27_s17 }
  0x10   :  { %s220_s18 = scalar_lea.vmem %s28_s17, 512  ;;  %p225_p6 = scmp.lt.s32.totalorder %s28_s17, %s28_s17 }
  0x11   :  { %p221_p5 = scmp.ne.s32.totalorder %s28_s17, %s220_s18  ;;  %p226_p7 = scmp.lt.s32.totalorder %s220_s18, %s220_s18 }
  0x13   :  { %p227_p8 = por %p226_p7, %p225_p6 }
  0x15   :  { %p228_p9 = pnand %p227_p8, %p221_p5 }
  0x17   :  { %231 = shalt.err (!%p228_p9)
}
  0x18   :  { %33 = dma.hbm_to_vmem [thread:$0]  %s306_s1, 512, %s28_s17, [#allocation7], %s259_s12, %s259_s12, %s260_s13  }
  0x19   :  { %252 = dma.done.wait [#allocation4], 256  }
  0x1a   :  { %253 = vsyncadd [#allocation4], 4294967040 }
  0x1b   :  { %254 = dma.done.wait [#allocation7], 512  }
  0x1c   :  { %255 = vsyncadd [#allocation7], 4294966784  ;;  %vm44_vm0 = vcmask 785408   ;;  %v262_v0 = vmov 0.0   ;;  %vm55_vm1 = vcmask 261120   ;;  %v54_v1 = vld [vmem:[#allocation6 + $0x18] sm:$0xff] }
  0x1d   :  { %46 = vst.msk [vmem:[#allocation2 + $0x8] sm:$0xff] %vm44_vm0, %v262_v0  ;;  %45 = vst.msk [vmem:[#allocation2] sm:$0xff] %vm44_vm0, %v262_v0  ;;  %v53_v2 = vld [vmem:[#allocation6 + $0x10] sm:$0xff]  ;;  %175 = vmatprep.subr.mxu0 %v54_v1  ;;  %v52_v4 = vld [vmem:[#allocation6 + $0x8] sm:$0xff]  ;;  %s263_s0 = smov [#allocation8]  }
  0x1e   :  { %v49_v3 = vld [vmem:[#allocation3] sm:$0xff]  ;;  %176 = vmatpush3.msra.mxu0 %v54_v1  ;;  %v51_v5 = vld [vmem:[#allocation6] sm:$0xff]  ;;  %v50_v6 = vld [vmem:[#allocation3 + $0x8] sm:$0xff]  ;;  %s154_s1 = sshll.u32 %s263_s0, 4  ;;  %s155_s1 = int_to_ptr.vmem [resolvable:$true] %s154_s1 }
  0x1f   :  { %183 = vmatprep.mubr.msk.f32.mxu0 %vm55_vm1, %v49_v3  ;;  %177 = vmatprep.subr.mxu0 %v53_v2  ;;  %s232_s21 = scalar_lea.vmem %s155_s1, 256  ;;  %p237_p11 = scmp.lt.s32.totalorder %s155_s1, %s155_s1 }
  0x20   :  { %178 = vmatpush3.msra.mxu0 %v53_v2  ;;  %p233_p10 = scmp.ne.s32.totalorder %s155_s1, %s232_s21  ;;  %p238_p12 = scmp.lt.s32.totalorder %s232_s21, %s232_s21 }
  0x21   :  { %179 = vmatprep.subr.mxu0 %v52_v4 }
  0x22   :  { %180 = vmatpush3.msra.mxu0 %v52_v4  ;;  %p239_p13 = por %p238_p12, %p237_p11 }
  0x23   :  { %181 = vmatprep.subr.mxu0 %v51_v5 }
  0x24   :  { %182 = vmatpush3.msra.mxu0 %v51_v5  ;;  %v48_v7 = vld [vmem:[#allocation2 + $0x8] sm:$0xff]  ;;  %v47_v9 = vld [vmem:[#allocation2] sm:$0xff]  ;;  %p240_p0 = pnand %p239_p13, %p233_p10 }
  0x25   :  { %184 = vmatmul.mubr.msk.f32.vlgmr.msra.gmra.mxu0 %vm55_vm1, %v50_v6 }
  0xe5   :  { %v185_v8 = vpop.f32.mrf.mxu0 }
  0xe6   :  { %v138_v10 = vadd.f32 %v185_v8, %v48_v7 }
  0xe7   :  { %v128_v11 = vpop.f32.mrf.mxu0 }
  0xe8   :  { %141 = vst.msk [vmem:[#allocation2 + $0x8] sm:$0xff] %vm44_vm0, %v138_v10  ;;  %v137_v12 = vadd.f32 %v128_v11, %v47_v9 }
  0xea   :  { %140 = vst.msk [vmem:[#allocation2] sm:$0xff] %vm44_vm0, %v137_v12 }
  0xef   :  { %v146_v13 = vld [vmem:[#allocation2 + $0x8] sm:$0xff] }
  0xf0   :  { %148 = vst.msk [vmem:[#allocation8 + $0x8] sm:$0xff] %vm44_vm0, %v146_v13 }
  0xf1   :  { %v145_v14 = vld [vmem:[#allocation2] sm:$0xff] }
  0xf2   :  { %147 = vst.msk [vmem:[#allocation8] sm:$0xff] %vm44_vm0, %v145_v14 }
  0xf3   :  { %243 = shalt.err (!%p240_p0)
}
  0xf4   :  { %160 = dma.vmem_to_hbm [thread:$0]  %s155_s1, 256, %s307_s2, [#allocation5], %s259_s12, %s259_s12, %s260_s13  }
  0xf5   :  { %256 = dma.done.wait [#allocation5], 256  }
  0xf6   :  { %257 = vsyncadd [#allocation5], 4294967040 }
  0xf7   :  { %164 = vsyncpa [#allocation4], 1 }
  0xf8   :  { %165 = vsyncpa [#allocation7], 1 }
  0xf9   :  { %166 = vsyncpa [#allocation5], 1 }

</bundles_post_ra>
